<compile_context>
chip_gen: v7x
topology: tpu7x:2x2x1
jax: 0.10.0
libtpu: 0.0.40
codegen_flags: <defaults>
</compile_context>

<pallas_src>
import functools

import jax
import jax.numpy as jnp
from jax import lax
from jax.experimental import pallas as pl
from jax.experimental.pallas import tpu as pltpu

KSIZE = 3  # ResDWC kernel_size (3x3, padding 1)


def _roll_lanes(v, shift, size):
    """np.roll-semantics rotation along the last (lane) axis by a static shift."""
    shift %= size
    if shift == 0:
        return v
    return pltpu.roll(v, shift, axis=1)


def _res_dwc_kernel(x_ref, w_ref, b_ref, o_ref, *, H, W, HW):
    # x_ref: (R, HW)  flattened H*W image plane per (batch, channel) row
    # w_ref: (R, 9)   depthwise 3x3 weights for that row, index = dy*3 + dx
    # b_ref: (R, 1)   bias
    # o_ref: (R, HW)  output block; also used as scratch for the row shifts
    x = x_ref[...]
    w = w_ref[...]
    b = b_ref[...]
    dt = x.dtype
    R = x.shape[0]

    def tap(k):  # (R, 1) per-channel weight, broadcast along lanes
        return w[:, k:k + 1]

    # --- row (H-direction) neighbours: one lane rotation each ----------------
    # The W wrapped lanes are zeroed with a narrow (R, W) store into o_ref
    # (scratch) instead of a full-tile mask multiply (VALU saver, see review).
    o_ref[...] = _roll_lanes(x, W, HW)             # candidate x[i-1, j]
    o_ref[:, 0:W] = jnp.zeros((R, W), dt)          # row 0 has no row above
    x_up = o_ref[...]

    o_ref[...] = _roll_lanes(x, HW - W, HW)        # candidate x[i+1, j]
    o_ref[:, HW - W:HW] = jnp.zeros((R, W), dt)    # row H-1 has no row below
    x_dn = o_ref[...]

    # --- column groups: weights applied BEFORE the +-1 lane shift ------------
    g_lf = x_up * tap(0) + x * tap(3) + x_dn * tap(6)   # taps that read col j-1
    g_rt = x_up * tap(2) + x * tap(5) + x_dn * tap(8)   # taps that read col j+1
    # Residual + bias + centre-column taps accumulated directly (no g_md temp).
    acc = x + b + x_up * tap(1) + x * tap(4) + x_dn * tap(7)

    # --- column (W-direction) shifts + in-kernel edge masks ------------------
    pos = lax.broadcasted_iota(jnp.int32, (1, HW), 1)
    if W & (W - 1) == 0:                  # power-of-two W: guaranteed-cheap path
        col = lax.bitwise_and(pos, W - 1)
    else:
        col = lax.rem(pos, W)             # pos >= 0, so plain rem is exact
    zero = jnp.zeros((), dt)
    acc = acc + jnp.where(col >= 1, _roll_lanes(g_lf, 1, HW), zero)
    acc = acc + jnp.where(col <= W - 2, _roll_lanes(g_rt, HW - 1, HW), zero)

    o_ref[...] = acc.astype(o_ref.dtype)


def _pick_row_tile(n_rows, hw, itemsize):
    """Row-block size over the flattened (B*C, H*W) array.

    Targets ~1 MiB of activation per grid step while keeping the ~8 full-tile
    temporaries plus double-buffered I/O around ~12 MiB (fits v7x's 64 MiB VMEM
    with headroom), and keeps >= ~8 grid steps when possible so the pipeline
    warms up and v7x's two TensorCores get an even split.
    """
    budget_rows = max(1, (1024 * 1024 // itemsize) // hw)
    max_rows = min(n_rows, budget_rows, max(8, pl.cdiv(n_rows, 8)))
    divisors = [r for r in range(1, max_rows + 1) if n_rows % r == 0]
    aligned = [r for r in divisors if r % 8 == 0]          # sublane-aligned blocks
    if aligned:
        return aligned[-1]
    if n_rows * hw * itemsize <= 4 * 1024 * 1024:          # full extent is always legal
        return n_rows
    return divisors[-1]


@jax.jit
def res_dwc(x_nchw, weight, bias):
    """x_nchw: (B, C, H, W); weight: (C, 1, 3, 3); bias: (C,).  Returns x + dwconv(x)."""
    B, C, H, W = x_nchw.shape
    HW = H * W
    N = B * C

    # Free, contiguous reshape; weights/bias tiled per (batch, channel) row so the
    # grid can be one flat axis (the tiled params are only B*C*10 elements).
    x = x_nchw.reshape(N, HW)
    wk = jnp.tile(weight.reshape(C, KSIZE * KSIZE), (B, 1)).astype(x.dtype)
    bk = jnp.tile(bias.reshape(C, 1), (B, 1)).astype(x.dtype)

    r_tile = _pick_row_tile(N, HW, x.dtype.itemsize)
    grid = (N // r_tile,)

    kernel = functools.partial(_res_dwc_kernel, H=H, W=W, HW=HW)

    out = pl.pallas_call(
        kernel,
        out_shape=jax.ShapeDtypeStruct((N, HW), x.dtype),
        grid_spec=pltpu.PrefetchScalarGridSpec(
            num_scalar_prefetch=0,
            grid=grid,
            in_specs=[
                pl.BlockSpec((r_tile, HW), lambda i: (i, 0)),
                pl.BlockSpec((r_tile, KSIZE * KSIZE), lambda i: (i, 0)),
                pl.BlockSpec((r_tile, 1), lambda i: (i, 0)),
            ],
            out_specs=pl.BlockSpec((r_tile, HW), lambda i: (i, 0)),
        ),
        compiler_params=pltpu.CompilerParams(
            dimension_semantics=("parallel",),
            vmem_limit_bytes=32 * 1024 * 1024,
        ),
    )(x, wk, bk)

    return out.reshape(B, C, H, W)


def _reference(x_nchw, weight, bias):
    # Pure-JAX reference: grouped (depthwise) conv, cross-correlation like PyTorch.
    C = x_nchw.shape[1]
    y = lax.conv_general_dilated(
        x_nchw, weight,
        window_strides=(1, 1), padding="SAME",
        dimension_numbers=("NCHW", "OIHW", "NCHW"),
        feature_group_count=C,
    )
    return x_nchw + y + bias[None, :, None, None]


if __name__ == "__main__":
    B, C, H, W = 2, 32, 16, 16
    key = jax.random.PRNGKey(0)
    kx, kw, kb = jax.random.split(key, 3)

    x = jax.random.normal(kx, (B, C, H, W), dtype=jnp.float32)
    # Shapes from nn.Conv2d(dim, dim, 3, 1, 1, groups=dim).
    weight = jax.random.normal(kw, (C, 1, KSIZE, KSIZE), dtype=jnp.float32) * 0.1
    bias = jax.random.normal(kb, (C,), dtype=jnp.float32) * 0.1

    out = jax.block_until_ready(res_dwc(x, weight, bias))

    ref = _reference(x, weight, bias)
    assert out.shape == ref.shape
    assert jnp.allclose(out, ref, atol=1e-4, rtol=1e-4), "mismatch vs reference"

    print("KERNEL_OK")
</pallas_src>

<mosaic_0001>
module attributes {stable_mosaic.version = 11 : i64} {
  func.func @_res_dwc_kernel(%arg0: i32, %arg1: memref<8x256xf32, #tpu.memory_space<vmem>>, %arg2: memref<8x9xf32, #tpu.memory_space<vmem>>, %arg3: memref<8x1xf32, #tpu.memory_space<vmem>>, %arg4: memref<8x256xf32, #tpu.memory_space<vmem>>) attributes {dimension_semantics = [#tpu.dimension_semantics<parallel>], iteration_bounds = array<i64: 8>, scalar_prefetch = 0 : i64, scratch_operands = 0 : i64, tpu.core_type = #tpu.core_type<tc>, window_params = [{transform_indices = @transform_0, window_bounds = array<i64: 8, 256>}, {transform_indices = @transform_1, window_bounds = array<i64: 8, 9>}, {transform_indices = @transform_2, window_bounds = array<i64: 8, 1>}, {transform_indices = @transform_3, window_bounds = array<i64: 8, 256>}]} {
    %c0 = arith.constant 0 : index
    %c0_0 = arith.constant 0 : index
    %0 = vector.load %arg1[%c0, %c0_0] : memref<8x256xf32, #tpu.memory_space<vmem>>, vector<8x256xf32>
    %c0_1 = arith.constant 0 : index
    %c0_2 = arith.constant 0 : index
    %1 = vector.load %arg2[%c0_1, %c0_2] : memref<8x9xf32, #tpu.memory_space<vmem>>, vector<8x9xf32>
    %c0_3 = arith.constant 0 : index
    %c0_4 = arith.constant 0 : index
    %2 = vector.load %arg3[%c0_3, %c0_4] : memref<8x1xf32, #tpu.memory_space<vmem>>, vector<8x1xf32>
    %c16_i32 = arith.constant 16 : i32
    %3 = tpu.dynamic_rotate %0 by %c16_i32 dim 1 : vector<8x256xf32>, i32 -> vector<8x256xf32>
    %c0_5 = arith.constant 0 : index
    %c0_6 = arith.constant 0 : index
    %4 = vector.load %arg4[%c0_5, %c0_6] : memref<8x256xf32, #tpu.memory_space<vmem>>, vector<8x256xf32>
    tpu.vector_store %arg4[%c0_5, %c0_6], %3 {strides = array<i32>} : memref<8x256xf32, #tpu.memory_space<vmem>>, vector<8x256xf32>,
    %cst = arith.constant 0.000000e+00 : f32
    %5 = vector.broadcast %cst : f32 to vector<8x16xf32>
    %c0_7 = arith.constant 0 : index
    %c0_8 = arith.constant 0 : index
    %6 = vector.load %arg4[%c0_7, %c0_8] : memref<8x256xf32, #tpu.memory_space<vmem>>, vector<8x16xf32>
    tpu.vector_store %arg4[%c0_7, %c0_8], %5 {strides = array<i32>} : memref<8x256xf32, #tpu.memory_space<vmem>>, vector<8x16xf32>,
    %c0_9 = arith.constant 0 : index
    %c0_10 = arith.constant 0 : index
    %7 = vector.load %arg4[%c0_9, %c0_10] : memref<8x256xf32, #tpu.memory_space<vmem>>, vector<8x256xf32>
    %c240_i32 = arith.constant 240 : i32
    %8 = tpu.dynamic_rotate %0 by %c240_i32 dim 1 : vector<8x256xf32>, i32 -> vector<8x256xf32>
    %c0_11 = arith.constant 0 : index
    %c0_12 = arith.constant 0 : index
    %9 = vector.load %arg4[%c0_11, %c0_12] : memref<8x256xf32, #tpu.memory_space<vmem>>, vector<8x256xf32>
    tpu.vector_store %arg4[%c0_11, %c0_12], %8 {strides = array<i32>} : memref<8x256xf32, #tpu.memory_space<vmem>>, vector<8x256xf32>,
    %cst_13 = arith.constant 0.000000e+00 : f32
    %10 = vector.broadcast %cst_13 : f32 to vector<8x16xf32>
    %c0_14 = arith.constant 0 : index
    %c240 = arith.constant 240 : index
    %11 = vector.load %arg4[%c0_14, %c240] : memref<8x256xf32, #tpu.memory_space<vmem>>, vector<8x16xf32>
    tpu.vector_store %arg4[%c0_14, %c240], %10 {strides = array<i32>} : memref<8x256xf32, #tpu.memory_space<vmem>>, vector<8x16xf32>,
    %c0_15 = arith.constant 0 : index
    %c0_16 = arith.constant 0 : index
    %12 = vector.load %arg4[%c0_15, %c0_16] : memref<8x256xf32, #tpu.memory_space<vmem>>, vector<8x256xf32>
    %13 = vector.extract_strided_slice %1 {offsets = [0, 0], sizes = [8, 1], strides = [1, 1]} : vector<8x9xf32> to vector<8x1xf32>
    %14 = vector.broadcast %13 : vector<8x1xf32> to vector<8x256xf32>
    %15 = arith.mulf %7, %14 : vector<8x256xf32>
    %16 = vector.extract_strided_slice %1 {offsets = [0, 3], sizes = [8, 1], strides = [1, 1]} : vector<8x9xf32> to vector<8x1xf32>
    %17 = vector.broadcast %16 : vector<8x1xf32> to vector<8x256xf32>
    %18 = arith.mulf %0, %17 : vector<8x256xf32>
    %19 = arith.addf %15, %18 : vector<8x256xf32>
    %20 = vector.extract_strided_slice %1 {offsets = [0, 6], sizes = [8, 1], strides = [1, 1]} : vector<8x9xf32> to vector<8x1xf32>
    %21 = vector.broadcast %20 : vector<8x1xf32> to vector<8x256xf32>
    %22 = arith.mulf %12, %21 : vector<8x256xf32>
    %23 = arith.addf %19, %22 : vector<8x256xf32>
    %24 = vector.extract_strided_slice %1 {offsets = [0, 2], sizes = [8, 1], strides = [1, 1]} : vector<8x9xf32> to vector<8x1xf32>
    %25 = vector.broadcast %24 : vector<8x1xf32> to vector<8x256xf32>
    %26 = arith.mulf %7, %25 : vector<8x256xf32>
    %27 = vector.extract_strided_slice %1 {offsets = [0, 5], sizes = [8, 1], strides = [1, 1]} : vector<8x9xf32> to vector<8x1xf32>
    %28 = vector.broadcast %27 : vector<8x1xf32> to vector<8x256xf32>
    %29 = arith.mulf %0, %28 : vector<8x256xf32>
    %30 = arith.addf %26, %29 : vector<8x256xf32>
    %31 = vector.extract_strided_slice %1 {offsets = [0, 8], sizes = [8, 1], strides = [1, 1]} : vector<8x9xf32> to vector<8x1xf32>
    %32 = vector.broadcast %31 : vector<8x1xf32> to vector<8x256xf32>
    %33 = arith.mulf %12, %32 : vector<8x256xf32>
    %34 = arith.addf %30, %33 : vector<8x256xf32>
    %35 = vector.broadcast %2 : vector<8x1xf32> to vector<8x256xf32>
    %36 = arith.addf %0, %35 : vector<8x256xf32>
    %37 = vector.extract_strided_slice %1 {offsets = [0, 1], sizes = [8, 1], strides = [1, 1]} : vector<8x9xf32> to vector<8x1xf32>
    %38 = vector.broadcast %37 : vector<8x1xf32> to vector<8x256xf32>
    %39 = arith.mulf %7, %38 : vector<8x256xf32>
    %40 = arith.addf %36, %39 : vector<8x256xf32>
    %41 = vector.extract_strided_slice %1 {offsets = [0, 4], sizes = [8, 1], strides = [1, 1]} : vector<8x9xf32> to vector<8x1xf32>
    %42 = vector.broadcast %41 : vector<8x1xf32> to vector<8x256xf32>
    %43 = arith.mulf %0, %42 : vector<8x256xf32>
    %44 = arith.addf %40, %43 : vector<8x256xf32>
    %45 = vector.extract_strided_slice %1 {offsets = [0, 7], sizes = [8, 1], strides = [1, 1]} : vector<8x9xf32> to vector<8x1xf32>
    %46 = vector.broadcast %45 : vector<8x1xf32> to vector<8x256xf32>
    %47 = arith.mulf %12, %46 : vector<8x256xf32>
    %48 = arith.addf %44, %47 : vector<8x256xf32>
    %49 = tpu.iota {dimensions = array<i32: 1>} : vector<1x256xi32>
    %c15_i32 = arith.constant 15 : i32
    %50 = vector.broadcast %c15_i32 : i32 to vector<1x256xi32>
    %51 = arith.andi %49, %50 : vector<1x256xi32>
    %c1_i32 = arith.constant 1 : i32
    %52 = vector.broadcast %c1_i32 : i32 to vector<1x256xi32>
    %53 = arith.cmpi sge, %51, %52 : vector<1x256xi32>
    %c1_i32_17 = arith.constant 1 : i32
    %54 = tpu.dynamic_rotate %23 by %c1_i32_17 dim 1 : vector<8x256xf32>, i32 -> vector<8x256xf32>
    %cst_18 = arith.constant 0.000000e+00 : f32
    %55 = vector.shape_cast %53 : vector<1x256xi1> to vector<1x256xi1>
    %56 = vector.broadcast %55 : vector<1x256xi1> to vector<8x256xi1>
    %57 = vector.broadcast %cst_18 : f32 to vector<8x256xf32>
    %58 = arith.select %56, %54, %57 : vector<8x256xi1>, vector<8x256xf32>
    %59 = arith.addf %48, %58 : vector<8x256xf32>
    %c14_i32 = arith.constant 14 : i32
    %60 = vector.broadcast %c14_i32 : i32 to vector<1x256xi32>
    %61 = arith.cmpi sle, %51, %60 : vector<1x256xi32>
    %c255_i32 = arith.constant 255 : i32
    %62 = tpu.dynamic_rotate %34 by %c255_i32 dim 1 : vector<8x256xf32>, i32 -> vector<8x256xf32>
    %cst_19 = arith.constant 0.000000e+00 : f32
    %63 = vector.shape_cast %61 : vector<1x256xi1> to vector<1x256xi1>
    %64 = vector.broadcast %63 : vector<1x256xi1> to vector<8x256xi1>
    %65 = vector.broadcast %cst_19 : f32 to vector<8x256xf32>
    %66 = arith.select %64, %62, %65 : vector<8x256xi1>, vector<8x256xf32>
    %67 = arith.addf %59, %66 : vector<8x256xf32>
    %c0_20 = arith.constant 0 : index
    %c0_21 = arith.constant 0 : index
    %68 = vector.load %arg4[%c0_20, %c0_21] : memref<8x256xf32, #tpu.memory_space<vmem>>, vector<8x256xf32>
    tpu.vector_store %arg4[%c0_20, %c0_21], %67 {strides = array<i32>} : memref<8x256xf32, #tpu.memory_space<vmem>>, vector<8x256xf32>,
    return
  }
  func.func @transform_0(%arg0: i32) -> (i32, i32) {
    %c0_i32 = arith.constant 0 : i32
    %c0_i32_0 = arith.constant 0 : i32
    return %arg0, %c0_i32 : i32, i32
  }
  func.func @transform_1(%arg0: i32) -> (i32, i32) {
    %c0_i32 = arith.constant 0 : i32
    %c0_i32_0 = arith.constant 0 : i32
    return %arg0, %c0_i32 : i32, i32
  }
  func.func @transform_2(%arg0: i32) -> (i32, i32) {
    %c0_i32 = arith.constant 0 : i32
    %c0_i32_0 = arith.constant 0 : i32
    return %arg0, %c0_i32 : i32, i32
  }
  func.func @transform_3(%arg0: i32) -> (i32, i32) {
    %c0_i32 = arith.constant 0 : i32
    %c0_i32_0 = arith.constant 0 : i32
    return %arg0, %c0_i32 : i32, i32
  }
}

</mosaic_0001>

<bundles_post_ra>
// kernel: res_dwc.1
= control target key start
LH: loop header
LB: loop body
LE: loop exit
PB: predicated region body
PF: predicated region fallthrough
CT: control target
= control target key end

     0   :  { %s520_s12 = smov 0   ;;  %s605_s0 = inlined_call_operand.vmem [shape: f32[64,256], index: 0, kind: input, shape index: {}]   ;;  %s606_s1 = inlined_call_operand.vmem [shape: f32[64,9], index: 1, kind: input, shape index: {}]   ;;  %s607_s2 = inlined_call_operand.vmem [shape: f32[64,1], index: 2, kind: input, shape index: {}]   ;;  %s608_s3 = inlined_call_operand.vmem [shape: f32[64,256], index: 3, kind: output, shape index: {}]  }
   0x1 LB: > { %s431_s13 = sadd.s32 4294967295, %s484_s12   ;;  %p435_p0 = scmp.ge.s32.totalorder %s484_s12, 1  ;;  %s484_s12 = sphi %s520_s12, %s13_s12  }
   0x2   : > { %p155_p1 = scmp.lt.s32.totalorder %s484_s12, 9 }
   0x4   : > { %p156_p2 = pnand %p435_p0, %p155_p1 }
   0x5   : > { %p187_p3 = scmp.lt.s32.totalorder (!%p156_p2), %s431_s13, 7  ;;  %v486_v0 = vmov (!%p156_p2), 3   ;;  %v487_v1 = vmov (!%p156_p2), 0   ;;  %s488_s19 = smov (!%p156_p2), 112   ;;  %v490_v5 = vmov (!%p156_p2), 6   ;;  %v491_v6 = vmov (!%p156_p2), 2  }
   0x6   : > { %159 = sbr.rel (%p156_p2) target bundleno = 292 (0x124), region = 32  ;;  %469 = vset.pattern.permute.xlu1 (!%p156_p2), %v486_v0  ;;  %468 = vset.pattern.permute.xlu0 (!%p156_p2), %v487_v1  ;;  %s489_s20 = smov (!%p156_p2), 16   ;;  %v492_v8 = vmov (!%p156_p2), 5   ;;  %v493_v9 = vmov (!%p156_p2), 8   ;;  %v494_v10 = vmov (!%p156_p2), 7   ;;  %v495_v11 = vmov (!%p156_p2), 1  }
   0x7   : > { %v496_v12 = vmov (!%p156_p2), 4   ;;  %v213_v13 = vlaneseq (!%p156_p2)  ;;  %vm220_vm2 = vcmask (!%p156_p2), 130048   ;;  %vm233_vm3 = vcmask (!%p156_p2), 1048448   ;;  %s498_s30 = smov (!%p156_p2), 1   ;;  %s499_s4 = smov (!%p156_p2), 127  }
   0x8   : > { %v497_v21 = vmov (!%p156_p2), 0.0  }
   0x9   : > { %v551_v14 = vand.u32 (!%p156_p2), 127, %v213_v13 }
   0xb   : > { %vm228_vm0 = vcmp.lt.s32.totalorder (!%p156_p2), %v551_v14, 112  ;;  %vm215_vm1 = vcmp.lt.s32.totalorder (!%p156_p2), %v551_v14, 16  ;;  %v313_v55 = vadd.s32 (!%p156_p2), 128, %v551_v14  ;;  %v314_v61 = vand.u32 (!%p156_p2), 15, %v551_v14 }
   0xc   : > { %vm322_vm4 = vcmp.lt.s32.totalorder (!%p156_p2), %v551_v14, 1  ;;  %vm339_vm7 = vcmp.lt.s32.totalorder (!%p156_p2), %v551_v14, 127 }
   0xd   : > { %s614_s13 = smov (!%p187_p3, %s431_s13), 7  ;;  %v315_v62 = vand.u32 15, %v313_v55  ;;  %vm587_vm5 = vcmp.ge.s32.totalorder %v314_v61, 1  ;;  %vm333_vm8 = vcmp.le.s32.totalorder %v314_v61, 14 }
   0xe   : > { %s444_s14 = sshll.u32 %s614_s13, 4  ;;  %s438_s18 = sshll.u32 %s614_s13, 3 }
   0xf   : > { %s191_s17 = scalar_lea.vmem %s605_s0, %s444_s14  ;;  %s195_s23 = scalar_lea.vmem %s606_s1, %s438_s18  ;;  %vm591_vm6 = vcmp.ge.s32.totalorder %v315_v62, 1  ;;  %vm334_vm9 = vcmp.le.s32.totalorder %v315_v62, 14 }
  0x10   : > { %v537_v2 = vld [vmem:[%s191_s17] sm:$0xff]  ;;  %v541_v3 = vld [vmem:[%s191_s17 + $0x8] sm:$0xff]  ;;  %s199_s26 = scalar_lea.vmem %s607_s2, %s438_s18  ;;  %s560_s29 = scalar_lea.vmem %s608_s3, %s444_s14 }
  0x11   : > { %224 = vrot.lane.b32.xlu1 %v537_v2, %s488_s19  ;;  %209 = vrot.lane.b32.xlu0 %v537_v2, %s489_s20  ;;  %v207_v4 = vld [vmem:[%s195_s23] sm:$0xff] }
  0x12   : > { %v208_v7 = vld [vmem:[%s199_s26] sm:$0xff] }
  0x15   : > { %226 = vrot.lane.b32.xlu1 %v541_v3, %s488_s19  ;;  %211 = vrot.lane.b32.xlu0 %v541_v3, %s489_s20 }
  0x19   : > { %245 = vperm.xlu1 %469, %v207_v4   ;;  %239 = vperm.xlu0 %468, %v207_v4  }
  0x1d   : > { %470 = vset.pattern.permute.xlu1 %v490_v5  ;;  %471 = vset.pattern.permute.xlu0 %v491_v6 }
  0x1e   : > { %253 = vperm.xlu1 %470, %v207_v4   ;;  %261 = vperm.xlu0 %471, %v207_v4  }
  0x22   : > { %472 = vset.pattern.permute.xlu1 %v492_v8  ;;  %474 = vset.pattern.permute.xlu0 %v487_v1 }
  0x23   : > { %267 = vperm.xlu1 %472, %v207_v4   ;;  %284 = vperm.xlu0 %474, %v208_v7  }
  0x27   : > { %473 = vset.pattern.permute.xlu1 %v493_v9  ;;  %477 = vset.pattern.permute.xlu0 %v494_v10 }
  0x28   : > { %275 = vperm.xlu1 %473, %v207_v4   ;;  %306 = vperm.xlu0 %477, %v207_v4  }
  0x2c   : > { %475 = vset.pattern.permute.xlu1 %v495_v11 }
  0x2d   : > { %290 = vperm.xlu1 %475, %v207_v4  }
  0x31   : > { %476 = vset.pattern.permute.xlu1 %v496_v12 }
  0x32   : > { %298 = vperm.xlu1 %476, %v207_v4  }
  0x83   : > { %v225_v15 = vpop.permute.xlu1 %224  ;;  %v210_v16 = vpop.permute.xlu0 %209 }
  0x87   : > { %v227_v17 = vpop.permute.xlu1 %226  ;;  %v212_v18 = vpop.permute.xlu0 %211 }
  0x88   : > { %v230_v19 = vsel %vm228_vm0, %v227_v17, %v225_v15  ;;  %v217_v20 = vsel %vm215_vm1, %v212_v18, %v210_v16  ;;  %v229_v27 = vsel %vm228_vm0, %v225_v15, %v227_v17  ;;  %v216_v28 = vsel %vm215_vm1, %v210_v16, %v212_v18 }
  0x89   : > { %218 = vst [vmem:[%s560_s29] sm:$0xff] %v217_v20  ;;  %232 = vst [vmem:[%s560_s29 + $0x8] sm:$0xff] %v230_v19 }
  0x8a   : > { %221 = vst.msk [vmem:[%s560_s29] sm:$0xff] %vm220_vm2, %v497_v21 }
  0x8b   : > { %234 = vst.msk [vmem:[%s560_s29 + $0x8] sm:$0xff] %vm233_vm3, %v497_v21 }
  0x91   : > { %v222_v22 = vld [vmem:[%s560_s29] sm:$0xff] }
  0x92   : > { %v236_v30 = vld [vmem:[%s560_s29 + $0x8] sm:$0xff] }
  0x98   : > { %v246_v23 = vpop.permute.xlu1 %245  ;;  %v240_v24 = vpop.permute.xlu0 %239 }
  0x99   : > { %v248_v25 = vmul.f32 %v246_v23, %v537_v2  ;;  %v242_v26 = vmul.f32 %v240_v24, %v222_v22  ;;  %v249_v31 = vmul.f32 %v246_v23, %v541_v3  ;;  %v243_v32 = vmul.f32 %v240_v24, %v216_v28 }
  0x9b   : > { %v250_v33 = vadd.f32 %v248_v25, %v242_v26  ;;  %v251_v37 = vadd.f32 %v249_v31, %v243_v32 }
  0x9d   : > { %v254_v29 = vpop.permute.xlu1 %253  ;;  %v262_v39 = vpop.permute.xlu0 %261 }
  0x9e   : > { %v256_v34 = vmul.f32 %v254_v29, %v229_v27  ;;  %v257_v35 = vmul.f32 %v254_v29, %v236_v30  ;;  %v264_v41 = vmul.f32 %v262_v39, %v222_v22  ;;  %v265_v44 = vmul.f32 %v262_v39, %v216_v28 }
  0xa0   : > { %v258_v36 = vadd.f32 %v256_v34, %v250_v33  ;;  %v259_v40 = vadd.f32 %v257_v35, %v251_v37 }
  0xa2   : > { %v268_v38 = vpop.permute.xlu1 %267  ;;  %318 = vrot.lane.b32.xlu1 %v258_v36, %s498_s30  ;;  %v285_v53 = vpop.permute.xlu0 %284 }
  0xa3   : > { %v270_v42 = vmul.f32 %v268_v38, %v537_v2  ;;  %v271_v43 = vmul.f32 %v268_v38, %v541_v3  ;;  %v287_v56 = vadd.f32 %v285_v53, %v537_v2  ;;  %v288_v58 = vadd.f32 %v285_v53, %v541_v3 }
  0xa5   : > { %v272_v46 = vadd.f32 %v270_v42, %v264_v41  ;;  %v273_v47 = vadd.f32 %v271_v43, %v265_v44 }
  0xa6   : > { %320 = vrot.lane.b32.xlu1 %v259_v40, %s498_s30 }
  0xa7   : > { %v276_v45 = vpop.permute.xlu1 %275  ;;  %v307_v4 = vpop.permute.xlu0 %306 }
  0xa8   : > { %v278_v48 = vmul.f32 %v276_v45, %v229_v27  ;;  %v279_v49 = vmul.f32 %v276_v45, %v236_v30  ;;  %v310_v6 = vmul.f32 %v307_v4, %v236_v30  ;;  %v309_v13 = vmul.f32 %v307_v4, %v229_v27 }
  0xaa   : > { %v280_v50 = vadd.f32 %v278_v48, %v272_v46  ;;  %v281_v51 = vadd.f32 %v279_v49, %v273_v47 }
  0xac   : > { %337 = vrot.lane.b32.xlu1 %v281_v51, %s499_s4  ;;  %335 = vrot.lane.b32.xlu0 %v280_v50, %s499_s4  ;;  %v291_v52 = vpop.permute.xlu1 %290 }
  0xad   : > { %v293_v57 = vmul.f32 %v291_v52, %v222_v22  ;;  %v294_v59 = vmul.f32 %v291_v52, %v216_v28 }
  0xaf   : > { %v295_v63 = vadd.f32 %v293_v57, %v287_v56  ;;  %v296_v5 = vadd.f32 %v294_v59, %v288_v58 }
  0xb1   : > { %v299_v54 = vpop.permute.xlu1 %298 }
  0xb2   : > { %v301_v0 = vmul.f32 %v299_v54, %v537_v2  ;;  %v302_v1 = vmul.f32 %v299_v54, %v541_v3 }
  0xb4   : > { %v303_v10 = vadd.f32 %v301_v0, %v295_v63  ;;  %v304_v11 = vadd.f32 %v302_v1, %v296_v5 }
  0xb6   : > { %v311_v16 = vadd.f32 %v309_v13, %v303_v10  ;;  %v312_v17 = vadd.f32 %v310_v6, %v304_v11 }
 0x114   : > { %v319_v60 = vpop.permute.xlu1 %318 }
 0x118   : > { %v321_v9 = vpop.permute.xlu1 %320 }
 0x119   : > { %v323_v12 = vsel %vm322_vm4, %v319_v60, %v321_v9  ;;  %v324_v2 = vsel %vm322_vm4, %v321_v9, %v319_v60 }
 0x11a   : > { %v329_v3 = vsel %vm587_vm5, %v324_v2, 0.0  ;;  %v330_v15 = vsel %vm591_vm6, %v323_v12, 0.0 }
 0x11b   : > { %v331_v20 = vadd.f32 %v329_v3, %v311_v16  ;;  %v332_v21 = vadd.f32 %v330_v15, %v312_v17 }
 0x11e   : > { %v338_v18 = vpop.permute.xlu1 %337  ;;  %v336_v19 = vpop.permute.xlu0 %335 }
 0x11f   : > { %v340_v22 = vsel %vm339_vm7, %v336_v19, %v338_v18  ;;  %v341_v23 = vsel %vm339_vm7, %v338_v18, %v336_v19 }
 0x120   : > { %v346_v24 = vsel %vm333_vm8, %v340_v22, 0.0  ;;  %v347_v25 = vsel %vm334_vm9, %v341_v23, 0.0 }
 0x121   : > { %v348_v26 = vadd.f32 %v346_v24, %v331_v20  ;;  %v349_v27 = vadd.f32 %v347_v25, %v332_v21 }
 0x123   : > { %350 = vst [vmem:[%s560_s29] sm:$0xff] %v348_v26  ;;  %351 = vst [vmem:[%s560_s29 + $0x8] sm:$0xff] %v349_v27 }
 0x124 PF: > { %s13_s12 = sadd.s32 1, %s484_s12  }
 0x125   : > { %p10_p4 = scmp.ge.s32.totalorder %s13_s12, 10  }
 0x127   :  { %12 = sbr.rel (!%p10_p4) target bundleno = 1 (0x1), region = 68 }

</bundles_post_ra>
